<compile_context>
chip_gen: v7x
topology: tpu7x:2x2x1
jax: 0.10.0
libtpu: 0.0.40
codegen_flags: <defaults>
</compile_context>

<pallas_src>
import functools

import jax
import jax.numpy as jnp
from jax import lax
from jax.experimental import pallas as pl
from jax.experimental.pallas import tpu as pltpu

_LANES = 128
_SUBLANES = 8
_TILE = _LANES * _SUBLANES  # 1024 elements -> one (8, 128) f32 tile


def _round_up(x, m):
    return ((x + m - 1) // m) * m


def _cdiv(a, b):
    return (a + b - 1) // b


def _select_tiling(max_block_rows):
    """Pick (block_rows cap, vmem_limit_bytes) per TPU generation (or user override)."""
    if max_block_rows is not None:
        br = max(_SUBLANES, _round_up(int(max_block_rows), _SUBLANES))
        # 4 vectors, double buffered, f32 + accumulator scratch + headroom.
        limit = 8 * br * _LANES * 4 + (8 * _SUBLANES * _LANES * 4) + (8 << 20)
        return br, max(limit, 16 << 20)
    try:
        vmem = int(getattr(pltpu.get_tpu_info(), "vmem_capacity_bytes",
                           64 * 1024 * 1024))
    except Exception:  # conservative fallback if the query is unavailable
        vmem = 64 * 1024 * 1024
    if vmem >= 100 * 1024 * 1024:          # v5e / v6e: 128 MiB physical VMEM
        return 8192, 48 * 1024 * 1024      # 32 MiB double-buffered footprint
    return 4096, 32 * 1024 * 1024          # v7x: 64 MiB physical VMEM


def _loss_con1_kernel(lam_ref, yp_ref, yn_ref, gp_ref, gn_ref, out_ref, acc_ref,
                      *, meta, inv_n, num_blocks):
    """Streaming per-lane sum / sum-of-squares + closed-form scalar finalize.

    lam_ref : SMEM (3,) f32
    *_ref   : VMEM (block_rows_k, 128) f32 blocks, order [y_pos, y_neg, g_pos, g_neg]
    out_ref : SMEM (1, 1) f32 scalar loss
    acc_ref : VMEM (8, 8, 128) f32 scratch -> [sum_k, sumsq_k] per-lane partials
    meta    : static tuple of (block_rows_k, rows_k, nblk_k) per vector
    inv_n   : static tuple of 1 / true_element_count per vector
    """
    step = pl.program_id(0)

    @pl.when(step == 0)
    def _init():
        acc_ref[...] = jnp.zeros(acc_ref.shape, acc_ref.dtype)

    refs = (yp_ref, yn_ref, gp_ref, gn_ref)
    for k in range(4):
        br, rows, nblk = meta[k]
        ref = refs[k]

        def _accum(k=k, ref=ref, br=br, rows=rows):
            xk = ref[...]                                   # (br, 128) f32
            if rows % br != 0:
                # Partial last block: rows past `rows` hold undefined VMEM data.
                rid = step * br + lax.broadcasted_iota(jnp.int32, (br, _LANES), 0)
                xk = jnp.where(rid < rows, xk, jnp.float32(0.0))
            x3 = xk.reshape(br // _SUBLANES, _SUBLANES, _LANES)
            acc_ref[2 * k] = acc_ref[2 * k] + jnp.sum(x3, axis=0)          # VPU adds
            acc_ref[2 * k + 1] = acc_ref[2 * k + 1] + jnp.sum(x3 * x3, axis=0)

        if nblk == num_blocks:      # statically always active -> no guard needed
            _accum()
        else:                       # short vector: skip steps past its last block
            pl.when(step < nblk)(_accum)

    @pl.when(step == num_blocks - 1)
    def _finalize():
        s = [jnp.sum(acc_ref[i]) for i in range(8)]   # 8 cross-lane reduces, once
        m_yp, q_yp = s[0] * inv_n[0], s[1] * inv_n[0]
        m_yn, q_yn = s[2] * inv_n[1], s[3] * inv_n[1]
        m_gp, q_gp = s[4] * inv_n[2], s[5] * inv_n[2]
        m_gn, q_gn = s[6] * inv_n[3], s[7] * inv_n[3]

        # mean_{i,j}(1 + a_i - b_j)^2 = 1 + E[a^2] + E[b^2] + 2E[a] - 2E[b] - 2E[a]E[b]
        loss1 = 1.0 + q_yn + q_yp + 2.0 * (m_yn - m_yp) - 2.0 * m_yn * m_yp
        s_g = 1.0 + q_gp + q_gn - 2.0 * m_gp * m_gn     # shared part of loss2/loss3
        d_g = 2.0 * (m_gp - m_gn)
        out_ref[0, 0] = (lam_ref[0] * loss1
                         + lam_ref[1] * (s_g + d_g)
                         + lam_ref[2] * (s_g - d_g))


def _closed_form(vecs, lam):
    """Pure-jnp closed form (fast path for small inputs / empty vectors)."""
    stats = []
    for v in vecs:
        n = int(v.size)
        inv = (1.0 / n) if n > 0 else float("nan")   # torch mean-of-empty -> nan
        stats.append((jnp.sum(v) * inv, jnp.sum(v * v) * inv))
    (m_yp, q_yp), (m_yn, q_yn), (m_gp, q_gp), (m_gn, q_gn) = stats
    loss1 = 1.0 + q_yn + q_yp + 2.0 * (m_yn - m_yp) - 2.0 * m_yn * m_yp
    s_g = 1.0 + q_gp + q_gn - 2.0 * m_gp * m_gn
    d_g = 2.0 * (m_gp - m_gn)
    return lam[0] * loss1 + lam[1] * (s_g + d_g) + lam[2] * (s_g - d_g)


def loss_con1(y_pred_pos, y_pred_neg, g_pred_pos, g_pred_neg, lam, *,
              max_block_rows=None, force_kernel=False, small_threshold=65536):
    """Pallas equivalent of loss_con1.forward. Returns a scalar float32."""
    f32 = jnp.float32
    vecs = [jnp.asarray(v, f32).reshape(-1)
            for v in (y_pred_pos, y_pred_neg, g_pred_pos, g_pred_neg)]
    lam = jnp.asarray(lam, f32).reshape(-1)
    counts = [int(v.size) for v in vecs]

    # Small / degenerate inputs: plain XLA closed form beats any kernel launch.
    if (not force_kernel and sum(counts) < small_threshold) or min(counts) == 0:
        return _closed_form(vecs, lam)

    block_cap, vmem_limit = _select_tiling(max_block_rows)

    slabs, meta = [], []
    for v, n in zip(vecs, counts):
        padded_n = _round_up(n, _TILE)          # pad only to own (8,128) multiple
        if padded_n != n:                       # zero-copy when already aligned
            v = jnp.pad(v, (0, padded_n - n))
        rows = padded_n // _LANES               # multiple of 8
        block_rows = min(block_cap, rows)
        nblk = _cdiv(rows, block_rows)
        slabs.append(v.reshape(rows, _LANES))
        meta.append((block_rows, rows, nblk))

    num_blocks = max(m[2] for m in meta)
    inv_n = tuple(1.0 / c for c in counts)      # padding zeros never enter the means

    in_specs = [pl.BlockSpec(memory_space=pltpu.MemorySpace.SMEM)]      # lam (3,)
    for block_rows, rows, nblk in meta:
        if nblk == num_blocks:
            imap = lambda i: (i, 0)
        else:   # clamp to this vector's last block once its stream is exhausted
            imap = (lambda last: (lambda i: (jnp.minimum(i, last), 0)))(nblk - 1)
        in_specs.append(pl.BlockSpec((block_rows, _LANES), imap))

    kernel = functools.partial(_loss_con1_kernel, meta=tuple(meta),
                               inv_n=inv_n, num_blocks=num_blocks)

    out = pl.pallas_call(
        kernel,
        out_shape=jax.ShapeDtypeStruct((1, 1), jnp.float32),
        grid_spec=pltpu.PrefetchScalarGridSpec(
            num_scalar_prefetch=0,
            grid=(num_blocks,),
            in_specs=in_specs,
            out_specs=pl.BlockSpec(memory_space=pltpu.MemorySpace.SMEM),
            scratch_shapes=[pltpu.VMEM((8, _SUBLANES, _LANES), jnp.float32)]),
        compiler_params=pltpu.CompilerParams(
            dimension_semantics=("arbitrary",),     # accumulator carried across steps
            vmem_limit_bytes=vmem_limit),
    )(lam, *slabs)
    return out[0, 0]


def _reference(y_pred_pos, y_pred_neg, g_pred_pos, g_pred_neg, lam):
    # Pure-JAX reference mirroring the PyTorch math (explicit outer difference).
    def pair_mean(a, b):  # mean_{i,j} (1 + a_i - b_j)^2
        d = 1.0 + a.reshape(-1, 1) - b.reshape(1, -1)
        return jnp.mean(d * d)

    loss1 = pair_mean(y_pred_neg.reshape(-1), y_pred_pos.reshape(-1))
    loss2 = pair_mean(g_pred_pos.reshape(-1), g_pred_neg.reshape(-1))
    loss3 = pair_mean(g_pred_neg.reshape(-1), g_pred_pos.reshape(-1))
    return lam[0] * loss1 + lam[1] * loss2 + lam[2] * loss3


if __name__ == "__main__":
    key = jax.random.PRNGKey(0)
    k1, k2, k3, k4 = jax.random.split(key, 4)

    # Small shapes consistent with the forward: 1-D prediction vectors + lam[3].
    y_pred_pos = jax.random.normal(k1, (8,), dtype=jnp.float32)
    y_pred_neg = jax.random.normal(k2, (8,), dtype=jnp.float32)
    g_pred_pos = jax.random.normal(k3, (16,), dtype=jnp.float32)
    g_pred_neg = jax.random.normal(k4, (16,), dtype=jnp.float32)
    lam = jnp.array([0.5, 0.3, 0.2], dtype=jnp.float32)

    out = loss_con1(y_pred_pos, y_pred_neg, g_pred_pos, g_pred_neg, lam,
                    force_kernel=True)
    out = jax.block_until_ready(out)
    ref = _reference(y_pred_pos, y_pred_neg, g_pred_pos, g_pred_neg, lam)
    assert jnp.allclose(out, ref, rtol=1e-5, atol=1e-5), (out, ref)

    # Multi-block path: mismatched lengths, ragged tails, clamped index maps,
    # partial-last-block masking; forced tiny block size -> several grid steps.
    k5, k6, k7, k8 = jax.random.split(jax.random.PRNGKey(1), 4)
    yp2 = jax.random.normal(k5, (2048,), dtype=jnp.float32)
    yn2 = jax.random.normal(k6, (3000,), dtype=jnp.float32)
    gp2 = jax.random.normal(k7, (1500,), dtype=jnp.float32)
    gn2 = jax.random.normal(k8, (5000,), dtype=jnp.float32)
    out2 = jax.block_until_ready(
        loss_con1(yp2, yn2, gp2, gn2, lam, force_kernel=True, max_block_rows=16))
    ref2 = _reference(yp2, yn2, gp2, gn2, lam)
    assert jnp.allclose(out2, ref2, rtol=1e-5, atol=1e-5), (out2, ref2)

    # Default (generation-auto) tiling path.
    out3 = jax.block_until_ready(
        loss_con1(yp2, yn2, gp2, gn2, lam, force_kernel=True))
    assert jnp.allclose(out3, ref2, rtol=1e-5, atol=1e-5), (out3, ref2)

    # Small-input fast path (pure closed form, no kernel launch).
    out4 = loss_con1(y_pred_pos, y_pred_neg, g_pred_pos, g_pred_neg, lam)
    assert jnp.allclose(out4, ref, rtol=1e-5, atol=1e-5), (out4, ref)

    print("KERNEL_OK")
</pallas_src>

<mosaic_0001>
module attributes {stable_mosaic.version = 11 : i64} {
  func.func @_loss_con1_kernel(%arg0: i32, %arg1: memref<3xf32, #tpu.memory_space<smem>>, %arg2: memref<8x128xf32, #tpu.memory_space<vmem>>, %arg3: memref<8x128xf32, #tpu.memory_space<vmem>>, %arg4: memref<8x128xf32, #tpu.memory_space<vmem>>, %arg5: memref<8x128xf32, #tpu.memory_space<vmem>>, %arg6: memref<1x1xf32, #tpu.memory_space<smem>>, %arg7: memref<8x8x128xf32, #tpu.memory_space<vmem>>) attributes {dimension_semantics = [#tpu.dimension_semantics<arbitrary>], iteration_bounds = array<i64: 1>, scalar_prefetch = 0 : i64, scratch_operands = 1 : i64, tpu.core_type = #tpu.core_type<tc>, window_params = [{transform_indices = @transform_0, window_bounds = array<i64: 3>}, {transform_indices = @transform_1, window_bounds = array<i64: 8, 128>}, {transform_indices = @transform_2, window_bounds = array<i64: 8, 128>}, {transform_indices = @transform_3, window_bounds = array<i64: 8, 128>}, {transform_indices = @transform_4, window_bounds = array<i64: 8, 128>}, {transform_indices = @transform_5, window_bounds = array<i64: 1, 1>}]} {
    %c0_i32 = arith.constant 0 : i32
    %0 = arith.cmpi eq, %arg0, %c0_i32 : i32
    %1 = arith.extui %0 : i1 to i32
    %c0_i32_0 = arith.constant 0 : i32
    %2 = arith.cmpi ne, %1, %c0_i32_0 : i32
    scf.if %2 {
      %cst_58 = arith.constant 0.000000e+00 : f32
      %74 = vector.broadcast %cst_58 : f32 to vector<8x8x128xf32>
      %c0_59 = arith.constant 0 : index
      %c0_60 = arith.constant 0 : index
      %c0_61 = arith.constant 0 : index
      %75 = vector.load %arg7[%c0_59, %c0_60, %c0_61] : memref<8x8x128xf32, #tpu.memory_space<vmem>>, vector<8x8x128xf32>
      tpu.vector_store %arg7[%c0_59, %c0_60, %c0_61], %74 {strides = array<i32>} : memref<8x8x128xf32, #tpu.memory_space<vmem>>, vector<8x8x128xf32>,
    } else {
    }
    %c0 = arith.constant 0 : index
    %c0_1 = arith.constant 0 : index
    %3 = vector.load %arg2[%c0, %c0_1] : memref<8x128xf32, #tpu.memory_space<vmem>>, vector<8x128xf32>
    %4 = vector.shape_cast %3 : vector<8x128xf32> to vector<1x8x128xf32>
    %c0_2 = arith.constant 0 : index
    %c0_3 = arith.constant 0 : index
    %c0_4 = arith.constant 0 : index
    %5 = vector.load %arg7[%c0_2, %c0_3, %c0_4] : memref<8x8x128xf32, #tpu.memory_space<vmem>>, vector<1x8x128xf32>
    %6 = vector.shape_cast %5 : vector<1x8x128xf32> to vector<8x128xf32>
    %cst = arith.constant dense<0.000000e+00> : vector<8x128xf32>
    %7 = vector.multi_reduction <add>, %4, %cst [0] : vector<1x8x128xf32> to vector<8x128xf32>
    %8 = arith.addf %6, %7 : vector<8x128xf32>
    %c0_5 = arith.constant 0 : index
    %c0_6 = arith.constant 0 : index
    %c0_7 = arith.constant 0 : index
    %9 = vector.load %arg7[%c0_5, %c0_6, %c0_7] : memref<8x8x128xf32, #tpu.memory_space<vmem>>, vector<1x8x128xf32>
    %10 = vector.shape_cast %9 : vector<1x8x128xf32> to vector<8x128xf32>
    %11 = vector.shape_cast %8 : vector<8x128xf32> to vector<1x8x128xf32>
    tpu.vector_store %arg7[%c0_5, %c0_6, %c0_7], %11 {strides = array<i32>} : memref<8x8x128xf32, #tpu.memory_space<vmem>>, vector<1x8x128xf32>,
    %c1 = arith.constant 1 : index
    %c0_8 = arith.constant 0 : index
    %c0_9 = arith.constant 0 : index
    %12 = vector.load %arg7[%c1, %c0_8, %c0_9] : memref<8x8x128xf32, #tpu.memory_space<vmem>>, vector<1x8x128xf32>
    %13 = vector.shape_cast %12 : vector<1x8x128xf32> to vector<8x128xf32>
    %14 = arith.mulf %4, %4 : vector<1x8x128xf32>
    %cst_10 = arith.constant dense<0.000000e+00> : vector<8x128xf32>
    %15 = vector.multi_reduction <add>, %14, %cst_10 [0] : vector<1x8x128xf32> to vector<8x128xf32>
    %16 = arith.addf %13, %15 : vector<8x128xf32>
    %c1_11 = arith.constant 1 : index
    %c0_12 = arith.constant 0 : index
    %c0_13 = arith.constant 0 : index
    %17 = vector.load %arg7[%c1_11, %c0_12, %c0_13] : memref<8x8x128xf32, #tpu.memory_space<vmem>>, vector<1x8x128xf32>
    %18 = vector.shape_cast %17 : vector<1x8x128xf32> to vector<8x128xf32>
    %19 = vector.shape_cast %16 : vector<8x128xf32> to vector<1x8x128xf32>
    tpu.vector_store %arg7[%c1_11, %c0_12, %c0_13], %19 {strides = array<i32>} : memref<8x8x128xf32, #tpu.memory_space<vmem>>, vector<1x8x128xf32>,
    %c0_14 = arith.constant 0 : index
    %c0_15 = arith.constant 0 : index
    %20 = vector.load %arg3[%c0_14, %c0_15] : memref<8x128xf32, #tpu.memory_space<vmem>>, vector<8x128xf32>
    %21 = vector.shape_cast %20 : vector<8x128xf32> to vector<1x8x128xf32>
    %c2 = arith.constant 2 : index
    %c0_16 = arith.constant 0 : index
    %c0_17 = arith.constant 0 : index
    %22 = vector.load %arg7[%c2, %c0_16, %c0_17] : memref<8x8x128xf32, #tpu.memory_space<vmem>>, vector<1x8x128xf32>
    %23 = vector.shape_cast %22 : vector<1x8x128xf32> to vector<8x128xf32>
    %cst_18 = arith.constant dense<0.000000e+00> : vector<8x128xf32>
    %24 = vector.multi_reduction <add>, %21, %cst_18 [0] : vector<1x8x128xf32> to vector<8x128xf32>
    %25 = arith.addf %23, %24 : vector<8x128xf32>
    %c2_19 = arith.constant 2 : index
    %c0_20 = arith.constant 0 : index
    %c0_21 = arith.constant 0 : index
    %26 = vector.load %arg7[%c2_19, %c0_20, %c0_21] : memref<8x8x128xf32, #tpu.memory_space<vmem>>, vector<1x8x128xf32>
    %27 = vector.shape_cast %26 : vector<1x8x128xf32> to vector<8x128xf32>
    %28 = vector.shape_cast %25 : vector<8x128xf32> to vector<1x8x128xf32>
    tpu.vector_store %arg7[%c2_19, %c0_20, %c0_21], %28 {strides = array<i32>} : memref<8x8x128xf32, #tpu.memory_space<vmem>>, vector<1x8x128xf32>,
    %c3 = arith.constant 3 : index
    %c0_22 = arith.constant 0 : index
    %c0_23 = arith.constant 0 : index
    %29 = vector.load %arg7[%c3, %c0_22, %c0_23] : memref<8x8x128xf32, #tpu.memory_space<vmem>>, vector<1x8x128xf32>
    %30 = vector.shape_cast %29 : vector<1x8x128xf32> to vector<8x128xf32>
    %31 = arith.mulf %21, %21 : vector<1x8x128xf32>
    %cst_24 = arith.constant dense<0.000000e+00> : vector<8x128xf32>
    %32 = vector.multi_reduction <add>, %31, %cst_24 [0] : vector<1x8x128xf32> to vector<8x128xf32>
    %33 = arith.addf %30, %32 : vector<8x128xf32>
    %c3_25 = arith.constant 3 : index
    %c0_26 = arith.constant 0 : index
    %c0_27 = arith.constant 0 : index
    %34 = vector.load %arg7[%c3_25, %c0_26, %c0_27] : memref<8x8x128xf32, #tpu.memory_space<vmem>>, vector<1x8x128xf32>
    %35 = vector.shape_cast %34 : vector<1x8x128xf32> to vector<8x128xf32>
    %36 = vector.shape_cast %33 : vector<8x128xf32> to vector<1x8x128xf32>
    tpu.vector_store %arg7[%c3_25, %c0_26, %c0_27], %36 {strides = array<i32>} : memref<8x8x128xf32, #tpu.memory_space<vmem>>, vector<1x8x128xf32>,
    %c0_28 = arith.constant 0 : index
    %c0_29 = arith.constant 0 : index
    %37 = vector.load %arg4[%c0_28, %c0_29] : memref<8x128xf32, #tpu.memory_space<vmem>>, vector<8x128xf32>
    %38 = vector.shape_cast %37 : vector<8x128xf32> to vector<1x8x128xf32>
    %c4 = arith.constant 4 : index
    %c0_30 = arith.constant 0 : index
    %c0_31 = arith.constant 0 : index
    %39 = vector.load %arg7[%c4, %c0_30, %c0_31] : memref<8x8x128xf32, #tpu.memory_space<vmem>>, vector<1x8x128xf32>
    %40 = vector.shape_cast %39 : vector<1x8x128xf32> to vector<8x128xf32>
    %cst_32 = arith.constant dense<0.000000e+00> : vector<8x128xf32>
    %41 = vector.multi_reduction <add>, %38, %cst_32 [0] : vector<1x8x128xf32> to vector<8x128xf32>
    %42 = arith.addf %40, %41 : vector<8x128xf32>
    %c4_33 = arith.constant 4 : index
    %c0_34 = arith.constant 0 : index
    %c0_35 = arith.constant 0 : index
    %43 = vector.load %arg7[%c4_33, %c0_34, %c0_35] : memref<8x8x128xf32, #tpu.memory_space<vmem>>, vector<1x8x128xf32>
    %44 = vector.shape_cast %43 : vector<1x8x128xf32> to vector<8x128xf32>
    %45 = vector.shape_cast %42 : vector<8x128xf32> to vector<1x8x128xf32>
    tpu.vector_store %arg7[%c4_33, %c0_34, %c0_35], %45 {strides = array<i32>} : memref<8x8x128xf32, #tpu.memory_space<vmem>>, vector<1x8x128xf32>,
    %c5 = arith.constant 5 : index
    %c0_36 = arith.constant 0 : index
    %c0_37 = arith.constant 0 : index
    %46 = vector.load %arg7[%c5, %c0_36, %c0_37] : memref<8x8x128xf32, #tpu.memory_space<vmem>>, vector<1x8x128xf32>
    %47 = vector.shape_cast %46 : vector<1x8x128xf32> to vector<8x128xf32>
    %48 = arith.mulf %38, %38 : vector<1x8x128xf32>
    %cst_38 = arith.constant dense<0.000000e+00> : vector<8x128xf32>
    %49 = vector.multi_reduction <add>, %48, %cst_38 [0] : vector<1x8x128xf32> to vector<8x128xf32>
    %50 = arith.addf %47, %49 : vector<8x128xf32>
    %c5_39 = arith.constant 5 : index
    %c0_40 = arith.constant 0 : index
    %c0_41 = arith.constant 0 : index
    %51 = vector.load %arg7[%c5_39, %c0_40, %c0_41] : memref<8x8x128xf32, #tpu.memory_space<vmem>>, vector<1x8x128xf32>
    %52 = vector.shape_cast %51 : vector<1x8x128xf32> to vector<8x128xf32>
    %53 = vector.shape_cast %50 : vector<8x128xf32> to vector<1x8x128xf32>
    tpu.vector_store %arg7[%c5_39, %c0_40, %c0_41], %53 {strides = array<i32>} : memref<8x8x128xf32, #tpu.memory_space<vmem>>, vector<1x8x128xf32>,
    %c0_42 = arith.constant 0 : index
    %c0_43 = arith.constant 0 : index
    %54 = vector.load %arg5[%c0_42, %c0_43] : memref<8x128xf32, #tpu.memory_space<vmem>>, vector<8x128xf32>
    %55 = vector.shape_cast %54 : vector<8x128xf32> to vector<1x8x128xf32>
    %c6 = arith.constant 6 : index
    %c0_44 = arith.constant 0 : index
    %c0_45 = arith.constant 0 : index
    %56 = vector.load %arg7[%c6, %c0_44, %c0_45] : memref<8x8x128xf32, #tpu.memory_space<vmem>>, vector<1x8x128xf32>
    %57 = vector.shape_cast %56 : vector<1x8x128xf32> to vector<8x128xf32>
    %cst_46 = arith.constant dense<0.000000e+00> : vector<8x128xf32>
    %58 = vector.multi_reduction <add>, %55, %cst_46 [0] : vector<1x8x128xf32> to vector<8x128xf32>
    %59 = arith.addf %57, %58 : vector<8x128xf32>
    %c6_47 = arith.constant 6 : index
    %c0_48 = arith.constant 0 : index
    %c0_49 = arith.constant 0 : index
    %60 = vector.load %arg7[%c6_47, %c0_48, %c0_49] : memref<8x8x128xf32, #tpu.memory_space<vmem>>, vector<1x8x128xf32>
    %61 = vector.shape_cast %60 : vector<1x8x128xf32> to vector<8x128xf32>
    %62 = vector.shape_cast %59 : vector<8x128xf32> to vector<1x8x128xf32>
    tpu.vector_store %arg7[%c6_47, %c0_48, %c0_49], %62 {strides = array<i32>} : memref<8x8x128xf32, #tpu.memory_space<vmem>>, vector<1x8x128xf32>,
    %c7 = arith.constant 7 : index
    %c0_50 = arith.constant 0 : index
    %c0_51 = arith.constant 0 : index
    %63 = vector.load %arg7[%c7, %c0_50, %c0_51] : memref<8x8x128xf32, #tpu.memory_space<vmem>>, vector<1x8x128xf32>
    %64 = vector.shape_cast %63 : vector<1x8x128xf32> to vector<8x128xf32>
    %65 = arith.mulf %55, %55 : vector<1x8x128xf32>
    %cst_52 = arith.constant dense<0.000000e+00> : vector<8x128xf32>
    %66 = vector.multi_reduction <add>, %65, %cst_52 [0] : vector<1x8x128xf32> to vector<8x128xf32>
    %67 = arith.addf %64, %66 : vector<8x128xf32>
    %c7_53 = arith.constant 7 : index
    %c0_54 = arith.constant 0 : index
    %c0_55 = arith.constant 0 : index
    %68 = vector.load %arg7[%c7_53, %c0_54, %c0_55] : memref<8x8x128xf32, #tpu.memory_space<vmem>>, vector<1x8x128xf32>
    %69 = vector.shape_cast %68 : vector<1x8x128xf32> to vector<8x128xf32>
    %70 = vector.shape_cast %67 : vector<8x128xf32> to vector<1x8x128xf32>
    tpu.vector_store %arg7[%c7_53, %c0_54, %c0_55], %70 {strides = array<i32>} : memref<8x8x128xf32, #tpu.memory_space<vmem>>, vector<1x8x128xf32>,
    %c0_i32_56 = arith.constant 0 : i32
    %71 = arith.cmpi eq, %arg0, %c0_i32_56 : i32
    %72 = arith.extui %71 : i1 to i32
    %c0_i32_57 = arith.constant 0 : i32
    %73 = arith.cmpi ne, %72, %c0_i32_57 : i32
    scf.if %73 {
      %c0_58 = arith.constant 0 : index
      %c0_59 = arith.constant 0 : index
      %c0_60 = arith.constant 0 : index
      %74 = vector.load %arg7[%c0_58, %c0_59, %c0_60] : memref<8x8x128xf32, #tpu.memory_space<vmem>>, vector<1x8x128xf32>
      %75 = vector.shape_cast %74 : vector<1x8x128xf32> to vector<8x128xf32>
      %76 = vector.shape_cast %75 : vector<8x128xf32> to vector<1x8x128xf32>
      %cst_61 = arith.constant dense<0.000000e+00> : vector<1xf32>
      %77 = vector.multi_reduction <add>, %76, %cst_61 [1, 2] : vector<1x8x128xf32> to vector<1xf32>
      %78 = vector.shape_cast %77 : vector<1xf32> to vector<1x1x1xf32>
      %79 = vector.extract %78[0, 0, 0] : f32 from vector<1x1x1xf32>
      %c1_62 = arith.constant 1 : index
      %c0_63 = arith.constant 0 : index
      %c0_64 = arith.constant 0 : index
      %80 = vector.load %arg7[%c1_62, %c0_63, %c0_64] : memref<8x8x128xf32, #tpu.memory_space<vmem>>, vector<1x8x128xf32>
      %81 = vector.shape_cast %80 : vector<1x8x128xf32> to vector<8x128xf32>
      %82 = vector.shape_cast %81 : vector<8x128xf32> to vector<1x8x128xf32>
      %cst_65 = arith.constant dense<0.000000e+00> : vector<1xf32>
      %83 = vector.multi_reduction <add>, %82, %cst_65 [1, 2] : vector<1x8x128xf32> to vector<1xf32>
      %84 = vector.shape_cast %83 : vector<1xf32> to vector<1x1x1xf32>
      %85 = vector.extract %84[0, 0, 0] : f32 from vector<1x1x1xf32>
      %c2_66 = arith.constant 2 : index
      %c0_67 = arith.constant 0 : index
      %c0_68 = arith.constant 0 : index
      %86 = vector.load %arg7[%c2_66, %c0_67, %c0_68] : memref<8x8x128xf32, #tpu.memory_space<vmem>>, vector<1x8x128xf32>
      %87 = vector.shape_cast %86 : vector<1x8x128xf32> to vector<8x128xf32>
      %88 = vector.shape_cast %87 : vector<8x128xf32> to vector<1x8x128xf32>
      %cst_69 = arith.constant dense<0.000000e+00> : vector<1xf32>
      %89 = vector.multi_reduction <add>, %88, %cst_69 [1, 2] : vector<1x8x128xf32> to vector<1xf32>
      %90 = vector.shape_cast %89 : vector<1xf32> to vector<1x1x1xf32>
      %91 = vector.extract %90[0, 0, 0] : f32 from vector<1x1x1xf32>
      %c3_70 = arith.constant 3 : index
      %c0_71 = arith.constant 0 : index
      %c0_72 = arith.constant 0 : index
      %92 = vector.load %arg7[%c3_70, %c0_71, %c0_72] : memref<8x8x128xf32, #tpu.memory_space<vmem>>, vector<1x8x128xf32>
      %93 = vector.shape_cast %92 : vector<1x8x128xf32> to vector<8x128xf32>
      %94 = vector.shape_cast %93 : vector<8x128xf32> to vector<1x8x128xf32>
      %cst_73 = arith.constant dense<0.000000e+00> : vector<1xf32>
      %95 = vector.multi_reduction <add>, %94, %cst_73 [1, 2] : vector<1x8x128xf32> to vector<1xf32>
      %96 = vector.shape_cast %95 : vector<1xf32> to vector<1x1x1xf32>
      %97 = vector.extract %96[0, 0, 0] : f32 from vector<1x1x1xf32>
      %c4_74 = arith.constant 4 : index
      %c0_75 = arith.constant 0 : index
      %c0_76 = arith.constant 0 : index
      %98 = vector.load %arg7[%c4_74, %c0_75, %c0_76] : memref<8x8x128xf32, #tpu.memory_space<vmem>>, vector<1x8x128xf32>
      %99 = vector.shape_cast %98 : vector<1x8x128xf32> to vector<8x128xf32>
      %100 = vector.shape_cast %99 : vector<8x128xf32> to vector<1x8x128xf32>
      %cst_77 = arith.constant dense<0.000000e+00> : vector<1xf32>
      %101 = vector.multi_reduction <add>, %100, %cst_77 [1, 2] : vector<1x8x128xf32> to vector<1xf32>
      %102 = vector.shape_cast %101 : vector<1xf32> to vector<1x1x1xf32>
      %103 = vector.extract %102[0, 0, 0] : f32 from vector<1x1x1xf32>
      %c5_78 = arith.constant 5 : index
      %c0_79 = arith.constant 0 : index
      %c0_80 = arith.constant 0 : index
      %104 = vector.load %arg7[%c5_78, %c0_79, %c0_80] : memref<8x8x128xf32, #tpu.memory_space<vmem>>, vector<1x8x128xf32>
      %105 = vector.shape_cast %104 : vector<1x8x128xf32> to vector<8x128xf32>
      %106 = vector.shape_cast %105 : vector<8x128xf32> to vector<1x8x128xf32>
      %cst_81 = arith.constant dense<0.000000e+00> : vector<1xf32>
      %107 = vector.multi_reduction <add>, %106, %cst_81 [1, 2] : vector<1x8x128xf32> to vector<1xf32>
      %108 = vector.shape_cast %107 : vector<1xf32> to vector<1x1x1xf32>
      %109 = vector.extract %108[0, 0, 0] : f32 from vector<1x1x1xf32>
      %c6_82 = arith.constant 6 : index
      %c0_83 = arith.constant 0 : index
      %c0_84 = arith.constant 0 : index
      %110 = vector.load %arg7[%c6_82, %c0_83, %c0_84] : memref<8x8x128xf32, #tpu.memory_space<vmem>>, vector<1x8x128xf32>
      %111 = vector.shape_cast %110 : vector<1x8x128xf32> to vector<8x128xf32>
      %112 = vector.shape_cast %111 : vector<8x128xf32> to vector<1x8x128xf32>
      %cst_85 = arith.constant dense<0.000000e+00> : vector<1xf32>
      %113 = vector.multi_reduction <add>, %112, %cst_85 [1, 2] : vector<1x8x128xf32> to vector<1xf32>
      %114 = vector.shape_cast %113 : vector<1xf32> to vector<1x1x1xf32>
      %115 = vector.extract %114[0, 0, 0] : f32 from vector<1x1x1xf32>
      %c7_86 = arith.constant 7 : index
      %c0_87 = arith.constant 0 : index
      %c0_88 = arith.constant 0 : index
      %116 = vector.load %arg7[%c7_86, %c0_87, %c0_88] : memref<8x8x128xf32, #tpu.memory_space<vmem>>, vector<1x8x128xf32>
      %117 = vector.shape_cast %116 : vector<1x8x128xf32> to vector<8x128xf32>
      %118 = vector.shape_cast %117 : vector<8x128xf32> to vector<1x8x128xf32>
      %cst_89 = arith.constant dense<0.000000e+00> : vector<1xf32>
      %119 = vector.multi_reduction <add>, %118, %cst_89 [1, 2] : vector<1x8x128xf32> to vector<1xf32>
      %120 = vector.shape_cast %119 : vector<1xf32> to vector<1x1x1xf32>
      %121 = vector.extract %120[0, 0, 0] : f32 from vector<1x1x1xf32>
      %cst_90 = arith.constant 1.250000e-01 : f32
      %122 = arith.mulf %79, %cst_90 : f32
      %cst_91 = arith.constant 1.250000e-01 : f32
      %123 = arith.mulf %85, %cst_91 : f32
      %cst_92 = arith.constant 1.250000e-01 : f32
      %124 = arith.mulf %91, %cst_92 : f32
      %cst_93 = arith.constant 1.250000e-01 : f32
      %125 = arith.mulf %97, %cst_93 : f32
      %cst_94 = arith.constant 6.250000e-02 : f32
      %126 = arith.mulf %103, %cst_94 : f32
      %cst_95 = arith.constant 6.250000e-02 : f32
      %127 = arith.mulf %109, %cst_95 : f32
      %cst_96 = arith.constant 6.250000e-02 : f32
      %128 = arith.mulf %115, %cst_96 : f32
      %cst_97 = arith.constant 6.250000e-02 : f32
      %129 = arith.mulf %121, %cst_97 : f32
      %cst_98 = arith.constant 1.000000e+00 : f32
      %130 = arith.addf %cst_98, %125 : f32
      %131 = arith.addf %130, %123 : f32
      %132 = arith.subf %124, %122 : f32
      %cst_99 = arith.constant 2.000000e+00 : f32
      %133 = arith.mulf %cst_99, %132 : f32
      %134 = arith.addf %131, %133 : f32
      %cst_100 = arith.constant 2.000000e+00 : f32
      %135 = arith.mulf %cst_100, %124 : f32
      %136 = arith.mulf %135, %122 : f32
      %137 = arith.subf %134, %136 : f32
      %cst_101 = arith.constant 1.000000e+00 : f32
      %138 = arith.addf %cst_101, %127 : f32
      %139 = arith.addf %138, %129 : f32
      %cst_102 = arith.constant 2.000000e+00 : f32
      %140 = arith.mulf %cst_102, %126 : f32
      %141 = arith.mulf %140, %128 : f32
      %142 = arith.subf %139, %141 : f32
      %143 = arith.subf %126, %128 : f32
      %cst_103 = arith.constant 2.000000e+00 : f32
      %144 = arith.mulf %cst_103, %143 : f32
      %c0_104 = arith.constant 0 : index
      %145 = memref.load %arg1[%c0_104] : memref<3xf32, #tpu.memory_space<smem>>
      %146 = arith.mulf %145, %137 : f32
      %c1_105 = arith.constant 1 : index
      %147 = memref.load %arg1[%c1_105] : memref<3xf32, #tpu.memory_space<smem>>
      %148 = arith.addf %142, %144 : f32
      %149 = arith.mulf %147, %148 : f32
      %150 = arith.addf %146, %149 : f32
      %c2_106 = arith.constant 2 : index
      %151 = memref.load %arg1[%c2_106] : memref<3xf32, #tpu.memory_space<smem>>
      %152 = arith.subf %142, %144 : f32
      %153 = arith.mulf %151, %152 : f32
      %154 = arith.addf %150, %153 : f32
      %c0_107 = arith.constant 0 : index
      %c0_108 = arith.constant 0 : index
      %155 = memref.load %arg6[%c0_107, %c0_108] : memref<1x1xf32, #tpu.memory_space<smem>>
      memref.store %154, %arg6[%c0_107, %c0_108] : memref<1x1xf32, #tpu.memory_space<smem>>
    } else {
    }
    return
  }
  func.func @transform_0(%arg0: i32) -> i32 {
    %c0_i32 = arith.constant 0 : i32
    %c0_i32_0 = arith.constant 0 : i32
    return %c0_i32 : i32
  }
  func.func @transform_1(%arg0: i32) -> (i32, i32) {
    %c0_i32 = arith.constant 0 : i32
    %c0_i32_0 = arith.constant 0 : i32
    return %arg0, %c0_i32 : i32, i32
  }
  func.func @transform_2(%arg0: i32) -> (i32, i32) {
    %c0_i32 = arith.constant 0 : i32
    %c0_i32_0 = arith.constant 0 : i32
    return %arg0, %c0_i32 : i32, i32
  }
  func.func @transform_3(%arg0: i32) -> (i32, i32) {
    %c0_i32 = arith.constant 0 : i32
    %c0_i32_0 = arith.constant 0 : i32
    return %arg0, %c0_i32 : i32, i32
  }
  func.func @transform_4(%arg0: i32) -> (i32, i32) {
    %c0_i32 = arith.constant 0 : i32
    %c0_i32_0 = arith.constant 0 : i32
    return %arg0, %c0_i32 : i32, i32
  }
  func.func @transform_5(%arg0: i32) -> (i32, i32) {
    %c0_i32 = arith.constant 0 : i32
    %c0_i32_0 = arith.constant 0 : i32
    %c0_i32_1 = arith.constant 0 : i32
    return %c0_i32, %c0_i32_0 : i32, i32
  }
}

</mosaic_0001>

<bundles_post_ra>
// kernel: tpu_custom_call.1
= control target key start
LH: loop header
LB: loop body
LE: loop exit
PB: predicated region body
PF: predicated region fallthrough
CT: control target
= control target key end

     0   :  { %10 = vsyncpa [#allocation5], 0  ;;  %s481_s0 = inlined_call_operand.hbm [shape: f32[3], index: 0, kind: input, shape index: {}]   ;;  %s482_s1 = inlined_call_operand.hbm [shape: f32[8,128], index: 1, kind: input, shape index: {}]   ;;  %s483_s2 = inlined_call_operand.hbm [shape: f32[8,128], index: 2, kind: input, shape index: {}]   ;;  %s484_s3 = inlined_call_operand.vmem [shape: f32[8,128], index: 3, kind: input, shape index: {}]   ;;  %s485_s4 = inlined_call_operand.hbm [shape: f32[8,128], index: 4, kind: input, shape index: {}]   ;;  %s486_s5 = inlined_call_operand.hbm [shape: f32[1,1], index: 5, kind: output, shape index: {}]  }
   0x1   :  { %11 = vsyncpa [#allocation4], 0 }
   0x2   :  { %12 = vsyncpa [#allocation9], 0 }
   0x3   :  { %13 = vsyncpa [#allocation6], 0  ;;  %s377_s18 = smov [#allocation8]   ;;  %s378_s20 = smov [#allocation7]  }
   0x4   :  { %s38_s19 = sshll.u32 %s377_s18, 4  ;;  %s28_s21 = sshll.u32 %s378_s20, 4  ;;  %s39_s19 = int_to_ptr.vmem [resolvable:$true] %s38_s19  ;;  %s29_s21 = int_to_ptr.vmem [resolvable:$true] %s28_s21 }
   0x5   :  { %s283_s24 = scalar_lea.hbm %s483_s2, 128 }
   0x6   :  { %p284_p0 = scmp.ne.s32.totalorder %s483_s2, %s283_s24  ;;  %p287_p1 = scmp.lt.u32.totalorder %s283_s24, %s483_s2 }
   0x8   :  { %p289_p2 = pnand %p287_p1, %p284_p0 }
   0xa   :  { %292 = shalt.err (!%p289_p2)
}
   0xb   :  { %s293_s29 = scalar_lea.vmem %s39_s19, 128  ;;  %p298_p4 = scmp.lt.s32.totalorder %s39_s19, %s39_s19 }
   0xc   :  { %p294_p3 = scmp.ne.s32.totalorder %s39_s19, %s293_s29  ;;  %p299_p5 = scmp.lt.s32.totalorder %s293_s29, %s293_s29 }
   0xe   :  { %p300_p6 = por %p299_p5, %p298_p4 }
  0x10   :  { %p301_p7 = pnand %p300_p6, %p294_p3 }
  0x12   :  { %304 = shalt.err (!%p301_p7)
}
  0x13   :  { %41 = dma.hbm_to_vmem [thread:$0]  %s483_s2, 128, %s39_s19, [#allocation9]  }
  0x14   :  { %s305_s9 = scalar_lea.hbm %s481_s0, 16 }
  0x15   :  { %p306_p8 = scmp.ne.s32.totalorder %s481_s0, %s305_s9  ;;  %p309_p9 = scmp.lt.u32.totalorder %s305_s9, %s481_s0 }
  0x17   :  { %p311_p10 = pnand %p309_p9, %p306_p8 }
  0x19   :  { %314 = shalt.err (!%p311_p10)
}
  0x1a   :  { %s379_s14 = smov [#allocation3]   ;;  %s315_s18 = scalar_lea.hbm %s482_s1, 128 }
  0x1b   :  { %21 = dma.hbm_to_smem %s481_s0, 16, %s379_s14, [#allocation5]  }
  0x1c   :  { %p316_p11 = scmp.ne.s32.totalorder %s482_s1, %s315_s18  ;;  %p319_p12 = scmp.lt.u32.totalorder %s315_s18, %s482_s1 }
  0x1e   :  { %p321_p13 = pnand %p319_p12, %p316_p11 }
  0x20   :  { %324 = shalt.err (!%p321_p13)
}
  0x21   :  { %s325_s24 = scalar_lea.vmem %s29_s21, 128  ;;  %p330_p1 = scmp.lt.s32.totalorder %s29_s21, %s29_s21 }
  0x22   :  { %p326_p0 = scmp.ne.s32.totalorder %s29_s21, %s325_s24  ;;  %p331_p2 = scmp.lt.s32.totalorder %s325_s24, %s325_s24 }
  0x24   :  { %p332_p3 = por %p331_p2, %p330_p1 }
  0x26   :  { %p333_p4 = pnand %p332_p3, %p326_p0 }
  0x28   :  { %336 = shalt.err (!%p333_p4)
}
  0x29   :  { %31 = dma.hbm_to_vmem [thread:$0]  %s482_s1, 128, %s29_s21, [#allocation4]  }
  0x2a   :  { %s380_s26 = smov [#allocation10]   ;;  %s337_s30 = scalar_lea.hbm %s485_s4, 128 }
  0x2b   :  { %s50_s27 = sshll.u32 %s380_s26, 4  ;;  %p338_p5 = scmp.ne.s32.totalorder %s485_s4, %s337_s30  ;;  %s51_s27 = int_to_ptr.vmem [resolvable:$true] %s50_s27 }
  0x2c   :  { %p341_p6 = scmp.lt.u32.totalorder %s337_s30, %s485_s4 }
  0x2e   :  { %p343_p7 = pnand %p341_p6, %p338_p5 }
  0x30   :  { %346 = shalt.err (!%p343_p7)
}
  0x31   :  { %s347_s10 = scalar_lea.vmem %s51_s27, 128  ;;  %p352_p9 = scmp.lt.s32.totalorder %s51_s27, %s51_s27 }
  0x32   :  { %p348_p8 = scmp.ne.s32.totalorder %s51_s27, %s347_s10  ;;  %p353_p10 = scmp.lt.s32.totalorder %s347_s10, %s347_s10 }
  0x34   :  { %p354_p11 = por %p353_p10, %p352_p9 }
  0x36   :  { %p355_p12 = pnand %p354_p11, %p348_p8 }
  0x38   :  { %358 = shalt.err (!%p355_p12)
}
  0x39   :  { %53 = dma.hbm_to_vmem [thread:$0]  %s485_s4, 128, %s51_s27, [#allocation9]  }
  0x3a   :  { %369 = dma.done.wait [#allocation5], 16  }
  0x3b   :  { %370 = vsyncadd [#allocation5], 4294967280 }
  0x3c   :  { %371 = dma.done.wait [#allocation4], 128  }
  0x3d   :  { %372 = vsyncadd [#allocation4], 4294967168 }
  0x3e   :  { %373 = dma.done.wait [#allocation9], 256  }
  0x3f   :  { %374 = vsyncadd [#allocation9], 4294967040 }
  0x40   :  { %66 = sfence }
  0x41   :  { %v90_v0 = vld [vmem:[#allocation8] sm:$0xff]  ;;  %v79_v1 = vld [vmem:[#allocation7] sm:$0xff]  ;;  %v102_v4 = vld [vmem:[%s484_s3] sm:$0xff]  ;;  %s463_s4 = sld [smem:[#allocation3]]  ;;  %s465_s13 = sld [smem:[#allocation3 + $0x1]] }
  0x42   :  { %150 = vadd.xlane.f32.xlu1 %v90_v0  ;;  %130 = vadd.xlane.f32.xlu0 %v79_v1  ;;  %v98_v2 = vmul.f32 %v90_v0, %v90_v0  ;;  %v86_v3 = vmul.f32 %v79_v1, %v79_v1  ;;  %v110_v5 = vmul.f32 %v102_v4, %v102_v4  ;;  %v114_v6 = vld [vmem:[#allocation10] sm:$0xff] }
  0x43   :  { %v122_v7 = vmul.f32 %v114_v6, %v114_v6 }
  0x46   :  { %160 = vadd.xlane.f32.xlu1 %v98_v2  ;;  %140 = vadd.xlane.f32.xlu0 %v86_v3 }
  0x4a   :  { %180 = vadd.xlane.f32.xlu1 %v110_v5  ;;  %170 = vadd.xlane.f32.xlu0 %v102_v4 }
  0x4e   :  { %200 = vadd.xlane.f32.xlu1 %v122_v7  ;;  %190 = vadd.xlane.f32.xlu0 %v114_v6 }
  0xcf   :  { %v151_v8 = vpop.xlane.xlu1 %150  ;;  %v131_v9 = vpop.xlane.xlu0 %130 }
  0xd0   :  { %v152_v10 = vrot.slane %v151_v8, 4  ;;  %v132_v11 = vrot.slane %v131_v9, 4 }
  0xd2   :  { %v153_v12 = vadd.f32 %v152_v10, %v151_v8  ;;  %v133_v13 = vadd.f32 %v132_v11, %v131_v9 }
  0xd3   :  { %v161_v14 = vpop.xlane.xlu1 %160  ;;  %v141_v15 = vpop.xlane.xlu0 %140 }
  0xd4   :  { %v154_v16 = vrot.slane %v153_v12, 2  ;;  %v134_v17 = vrot.slane %v133_v13, 2  ;;  %v162_v18 = vrot.slane %v161_v14, 4  ;;  %v142_v19 = vrot.slane %v141_v15, 4 }
  0xd6   :  { %v163_v20 = vadd.f32 %v162_v18, %v161_v14  ;;  %v143_v21 = vadd.f32 %v142_v19, %v141_v15  ;;  %v135_v22 = vadd.f32 %v134_v17, %v133_v13  ;;  %v155_v25 = vadd.f32 %v154_v16, %v153_v12 }
  0xd7   :  { %v181_v23 = vpop.xlane.xlu1 %180  ;;  %v171_v24 = vpop.xlane.xlu0 %170 }
  0xd8   :  { %v164_v26 = vrot.slane %v163_v20, 2  ;;  %v144_v27 = vrot.slane %v143_v21, 2  ;;  %v182_v28 = vrot.slane %v181_v23, 4  ;;  %v172_v29 = vrot.slane %v171_v24, 4 }
  0xd9   :  { %v136_v30 = vrot.slane %v135_v22, 1  ;;  %v156_v38 = vrot.slane %v155_v25, 1 }
  0xda   :  { %v183_v31 = vadd.f32 %v182_v28, %v181_v23  ;;  %v173_v32 = vadd.f32 %v172_v29, %v171_v24  ;;  %v145_v33 = vadd.f32 %v144_v27, %v143_v21  ;;  %v165_v34 = vadd.f32 %v164_v26, %v163_v20 }
  0xdb   :  { %v201_v35 = vpop.xlane.xlu1 %200  ;;  %v191_v36 = vpop.xlane.xlu0 %190  ;;  %v137_v37 = vadd.f32 %v136_v30, %v135_v22  ;;  %v157_v50 = vadd.f32 %v156_v38, %v155_v25 }
  0xdc   :  { %v184_v39 = vrot.slane %v183_v31, 2  ;;  %v174_v40 = vrot.slane %v173_v32, 2  ;;  %v202_v41 = vrot.slane %v201_v35, 4  ;;  %v192_v42 = vrot.slane %v191_v36, 4 }
  0xdd   :  { %262 = vpush %v137_v37  ;;  %v146_v43 = vrot.slane %v145_v33, 1  ;;  %v166_v44 = vrot.slane %v165_v34, 1 }
  0xde   :  { %v203_v45 = vadd.f32 %v202_v41, %v201_v35  ;;  %v193_v46 = vadd.f32 %v192_v42, %v191_v36  ;;  %v175_v47 = vadd.f32 %v174_v40, %v173_v32  ;;  %v185_v48 = vadd.f32 %v184_v39, %v183_v31 }
  0xdf   :  { %v147_v49 = vadd.f32 %v146_v43, %v145_v33  ;;  %v167_v51 = vadd.f32 %v166_v44, %v165_v34 }
  0xe0   :  { %v204_v52 = vrot.slane %v203_v45, 2  ;;  %v194_v53 = vrot.slane %v193_v46, 2  ;;  %v176_v54 = vrot.slane %v175_v47, 1  ;;  %v186_v55 = vrot.slane %v185_v48, 1 }
  0xe1   :  { %264 = vpush %v147_v49 }
  0xe2   :  { %v205_v56 = vadd.f32 %v204_v52, %v203_v45  ;;  %v195_v57 = vadd.f32 %v194_v53, %v193_v46  ;;  %266 = vpush %v157_v50  ;;  %v177_v58 = vadd.f32 %v176_v54, %v175_v47  ;;  %v187_v59 = vadd.f32 %v186_v55, %v185_v48 }
  0xe3   :  { %268 = vpush %v167_v51 }
  0xe4   :  { %270 = vpush %v177_v58  ;;  %v196_v60 = vrot.slane %v195_v57, 1  ;;  %v206_v61 = vrot.slane %v205_v56, 1 }
  0xe5   :  { %272 = vpush %v187_v59 }
  0xe6   :  { %v197_v62 = vadd.f32 %v196_v60, %v195_v57  ;;  %v207_v63 = vadd.f32 %v206_v61, %v205_v56 }
  0xe8   :  { %274 = vpush %v197_v62 }
  0xe9   :  { %276 = vpush %v207_v63 }
 0x10e   :  { %s263_s3 = spop %262 }
 0x10f   :  { %s209_s14 = smul.f32 0.125, %s263_s3  ;;  %s261_s3 = sld [smem:[#allocation3 + $0x2]] }
 0x112   :  { %s265_s15 = spop %264 }
 0x113   :  { %s210_s16 = smul.f32 0.125, %s265_s15  ;;  %s267_s2 = spop %266 }
 0x114   :  { %s211_s17 = smul.f32 0.125, %s267_s2  ;;  %s269_s18 = spop %268 }
 0x115   :  { %s212_s19 = smul.f32 0.125, %s269_s18  ;;  %s271_s20 = spop %270 }
 0x116   :  { %s219_s22 = ssub.f32 %s211_s17, %s209_s14  ;;  %s222_s23 = smul.f32 2.0, %s211_s17 }
 0x117   :  { %s217_s24 = sadd.f32 1.0, %s212_s19  ;;  %s213_s0 = smul.f32 0.0625, %s271_s20 }
 0x118   :  { %s220_s25 = smul.f32 2.0, %s219_s22  ;;  %s273_s26 = spop %272 }
 0x119   :  { %s223_s27 = smul.f32 %s222_s23, %s209_s14  ;;  %s218_s28 = sadd.f32 %s217_s24, %s210_s16 }
 0x11a   :  { %s227_s29 = smul.f32 2.0, %s213_s0  ;;  %s275_s30 = spop %274 }
 0x11b   :  { %s221_s6 = sadd.f32 %s220_s25, %s218_s28  ;;  %s214_s7 = smul.f32 0.0625, %s273_s26 }
 0x11c   :  { %s215_s8 = smul.f32 0.0625, %s275_s30  ;;  %s277_s9 = spop %276 }
 0x11d   :  { %s225_s10 = sadd.f32 1.0, %s214_s7  ;;  %s216_s1 = smul.f32 0.0625, %s277_s9 }
 0x11e   :  { %s228_s21 = smul.f32 %s227_s29, %s215_s8  ;;  %s230_s11 = ssub.f32 %s213_s0, %s215_s8 }
 0x11f   :  { %s226_s12 = sadd.f32 %s225_s10, %s216_s1  ;;  %s359_s26 = scalar_lea.hbm %s486_s5, 16 }
 0x120   :  { %s231_s15 = smul.f32 2.0, %s230_s11  ;;  %s224_s2 = ssub.f32 %s221_s6, %s223_s27 }
 0x121   :  { %s229_s17 = ssub.f32 %s226_s12, %s228_s21  ;;  %p360_p13 = scmp.ne.s32.totalorder %s486_s5, %s359_s26 }
 0x122   :  { %s233_s14 = smul.f32 %s463_s4, %s224_s2  ;;  %p363_p0 = scmp.lt.u32.totalorder %s359_s26, %s486_s5 }
 0x123   :  { %s235_s18 = sadd.f32 %s231_s15, %s229_s17 }
 0x124   :  { %s239_s16 = ssub.f32 %s229_s17, %s231_s15  ;;  %p365_p1 = pnand %p363_p0, %p360_p13 }
 0x125   :  { %s236_s19 = smul.f32 %s465_s13, %s235_s18 }
 0x126   :  { %s240_s22 = smul.f32 %s261_s3, %s239_s16 }
 0x127   :  { %s237_s20 = sadd.f32 %s236_s19, %s233_s14 }
 0x129   :  { %s241_s23 = sadd.f32 %s240_s22, %s237_s20 }
 0x12b   :  { %243 = sst [smem:[#allocation11]] %s241_s23 }
 0x12c   :  { %368 = shalt.err (!%p365_p1)
}
 0x12d   :  { %s381_s4 = smov [#allocation11]  }
 0x12e   :  { %251 = dma.smem_to_hbm %s381_s4, 16, %s486_s5, [#allocation6]  }
 0x12f   :  { %375 = dma.done.wait [#allocation6], 16  }
 0x130   :  { %376 = vsyncadd [#allocation6], 4294967280 }
 0x131   :  { %255 = sfence }
 0x132   :  { %256 = vsyncpa [#allocation4], 1 }
 0x133   :  { %257 = vsyncpa [#allocation9], 1 }
 0x134   :  { %258 = vsyncpa [#allocation5], 1 }
 0x135   :  { %259 = vsyncpa [#allocation6], 1 }

</bundles_post_ra>
